<compile_context>
chip_gen: v7x
topology: tpu7x:2x2x1
jax: 0.10.0
libtpu: 0.0.40
codegen_flags: <defaults>
</compile_context>

<pallas_src>
import jax
import jax.numpy as jnp
from jax.experimental import pallas as pl
from jax.experimental.pallas import tpu as pltpu


def _em_kernel(x_ref, ent_ref):
    # x_ref: [TB, C] contiguous rows of the untransposed input block.
    xb = x_ref[...].astype(jnp.float32)            # [TB, C]
    x = jnp.transpose(xb)                          # [C, TB] lane-dense (XLU)
    c = x.shape[0]
    half = c // 2

    # Numerically-stable softmax pieces, folded before normalization:
    #   p = e / Z ; ps = (e[:half] + e[half:]) / Z = es / Z
    #   -(ps*log ps).sum = log Z - (1/Z) * sum(es * log es)
    m = jnp.max(x, axis=0, keepdims=True)          # [1, TB]
    e = jnp.exp(x - m)                             # [C, TB]
    z = jnp.sum(e, axis=0, keepdims=True)          # [1, TB]
    es = e[:half, :] + e[half:, :]                 # [C//2, TB] sublane fold

    tiny = jnp.float32(jnp.finfo(jnp.float32).tiny)
    s = jnp.sum(es * jnp.log(jnp.maximum(es, tiny)),
                axis=0, keepdims=True)             # [1, TB]

    # EUP approximate reciprocal + one Newton step (z in [1, C], so this is
    # ~f32-accurate and only touches the reduced [1, TB] row).
    inv_z = pl.reciprocal(z, approx=True)
    inv_z = inv_z * (2.0 - z * inv_z)

    ent_ref[...] = jnp.log(z) - inv_z * s          # [1, TB] lane-dense


def _round_up(v, m):
    return (v + m - 1) // m * m


def _tile_plan(b, c, in_itemsize):
    """Pick the batch tile (columns) and a VMEM limit computed from block sizes."""
    lane_c = _round_up(max(c, 1), 128)             # lane padding of the [TB, C] block
    # Per batch-column VMEM cost: double-buffered input block (lane padded)
    # plus ~6x full-size f32 temporaries in the lane-dense [C, TB] layout.
    per_col = 2 * lane_c * in_itemsize + 6 * c * 4
    budget = 16 * 1024 * 1024
    cap = max(128, min(8192, (budget // per_col) // 128 * 128))

    if b <= 128:
        tb = 128                                   # single (tiny) tile
    else:
        # >= 2 tiles so the "parallel" grid axis can shard across both
        # TensorCores on v7x; for large B the budget cap dominates.
        tb = min(cap, _round_up(pl.cdiv(b, 2), 128))
    tb = max(128, tb)

    vmem_limit = (2 * tb * lane_c * in_itemsize    # double-buffered input block
                  + 8 * c * tb * 4                 # f32 temporaries (headroom)
                  + (4 << 20))                     # slack
    vmem_limit = int(min(24 * 1024 * 1024, max(8 * 1024 * 1024, vmem_limit)))
    return tb, vmem_limit


@jax.jit
def my_criterion_em(x):
    """x: [B, C] logits (C even, any float dtype). Returns scalar f32 loss
    matching My_criterion_Em.forward (mean entropy of half-folded softmax)."""
    B, C = x.shape
    if C % 2 != 0:
        raise ValueError("channel dim must be even")

    itemsize = jnp.dtype(x.dtype).itemsize
    tb, vmem_limit = _tile_plan(B, C, itemsize)

    xin = x
    b_work = B
    if B < tb:
        # Tiny batch: pad rows up to one full tile (a few KB, negligible).
        xin = jnp.pad(x, ((0, tb - B), (0, 0)))
        b_work = tb

    n_tiles = pl.cdiv(b_work, tb)
    out_cols = n_tiles * tb                        # output never goes OOB

    ent = pl.pallas_call(
        _em_kernel,
        out_shape=jax.ShapeDtypeStruct((1, out_cols), jnp.float32),
        grid_spec=pltpu.PrefetchScalarGridSpec(
            num_scalar_prefetch=0,
            grid=(n_tiles,),
            in_specs=[pl.BlockSpec((tb, C), lambda i: (i, 0))],
            out_specs=pl.BlockSpec((1, tb), lambda i: (0, i)),
        ),
        compiler_params=pltpu.CompilerParams(
            dimension_semantics=("parallel",),     # shard grid across TCs (v7x)
            vmem_limit_bytes=vmem_limit,
        ),
    )(xin)

    # Tiny final reduction in plain JAX; padded / out-of-range columns dropped
    # *before* the mean (they hold garbage or log(C/2) for zero-padded rows).
    return jnp.sum(ent[0, :B]) / jnp.float32(B)


def _reference(x):
    p = jax.nn.softmax(x.astype(jnp.float32), axis=1)
    half = x.shape[1] // 2
    ps = p[:, :half] + p[:, half:]
    return -(ps * jnp.log(ps)).sum(1).mean()


if __name__ == "__main__":
    # Small shape consistent with the module (batch, channels), C even.
    B, C = 8, 32
    x = jax.random.normal(jax.random.PRNGKey(0), (B, C), dtype=jnp.float32)
    loss = jax.block_until_ready(my_criterion_em(x))
    ref = jax.block_until_ready(_reference(x))
    assert jnp.allclose(loss, ref, atol=3e-5, rtol=3e-5), (loss, ref)

    # Also exercise the multi-tile path with a ragged (non-tile-multiple) batch.
    B2, C2 = 300, 32
    x2 = jax.random.normal(jax.random.PRNGKey(1), (B2, C2), dtype=jnp.float32)
    loss2 = jax.block_until_ready(my_criterion_em(x2))
    ref2 = jax.block_until_ready(_reference(x2))
    assert jnp.allclose(loss2, ref2, atol=3e-5, rtol=3e-5), (loss2, ref2)

    print("KERNEL_OK")
</pallas_src>

<mosaic_0001>
module attributes {stable_mosaic.version = 11 : i64} {
  func.func @_em_kernel(%arg0: i32, %arg1: memref<128x32xf32, #tpu.memory_space<vmem>>, %arg2: memref<1x128xf32, #tpu.memory_space<vmem>>) attributes {dimension_semantics = [#tpu.dimension_semantics<parallel>], iteration_bounds = array<i64: 1>, scalar_prefetch = 0 : i64, scratch_operands = 0 : i64, tpu.core_type = #tpu.core_type<tc>, window_params = [{transform_indices = @transform_0, window_bounds = array<i64: 128, 32>}, {transform_indices = @transform_1, window_bounds = array<i64: 1, 128>}]} {
    %c0 = arith.constant 0 : index
    %c0_0 = arith.constant 0 : index
    %0 = vector.load %arg1[%c0, %c0_0] : memref<128x32xf32, #tpu.memory_space<vmem>>, vector<128x32xf32>
    %1 = tpu.transpose %0, [1, 0] : vector<128x32xf32> -> vector<32x128xf32>
    %cst = arith.constant dense<0xFF800000> : vector<128xf32>
    %2 = vector.multi_reduction <maximumf>, %1, %cst [0] : vector<32x128xf32> to vector<128xf32>
    %3 = vector.shape_cast %2 : vector<128xf32> to vector<1x128xf32>
    %4 = vector.broadcast %3 : vector<1x128xf32> to vector<32x128xf32>
    %5 = arith.subf %1, %4 : vector<32x128xf32>
    %6 = math.exp %5 : vector<32x128xf32>
    %cst_1 = arith.constant dense<0.000000e+00> : vector<128xf32>
    %7 = vector.multi_reduction <add>, %6, %cst_1 [0] : vector<32x128xf32> to vector<128xf32>
    %8 = vector.shape_cast %7 : vector<128xf32> to vector<1x128xf32>
    %9 = vector.extract_strided_slice %6 {offsets = [0, 0], sizes = [16, 128], strides = [1, 1]} : vector<32x128xf32> to vector<16x128xf32>
    %10 = vector.extract_strided_slice %6 {offsets = [16, 0], sizes = [16, 128], strides = [1, 1]} : vector<32x128xf32> to vector<16x128xf32>
    %11 = arith.addf %9, %10 : vector<16x128xf32>
    %cst_2 = arith.constant 1.17549435E-38 : f32
    %12 = vector.broadcast %cst_2 : f32 to vector<16x128xf32>
    %13 = arith.maximumf %11, %12 : vector<16x128xf32>
    %14 = math.log %13 : vector<16x128xf32>
    %15 = arith.mulf %11, %14 : vector<16x128xf32>
    %cst_3 = arith.constant dense<0.000000e+00> : vector<128xf32>
    %16 = vector.multi_reduction <add>, %15, %cst_3 [0] : vector<16x128xf32> to vector<128xf32>
    %17 = vector.shape_cast %16 : vector<128xf32> to vector<1x128xf32>
    %18 = tpu.reciprocal %8 {approx = true} : vector<1x128xf32> -> vector<1x128xf32>
    %19 = arith.mulf %8, %18 : vector<1x128xf32>
    %cst_4 = arith.constant 2.000000e+00 : f32
    %20 = vector.broadcast %cst_4 : f32 to vector<1x128xf32>
    %21 = arith.subf %20, %19 : vector<1x128xf32>
    %22 = arith.mulf %18, %21 : vector<1x128xf32>
    %23 = math.log %8 : vector<1x128xf32>
    %24 = arith.mulf %22, %17 : vector<1x128xf32>
    %25 = arith.subf %23, %24 : vector<1x128xf32>
    %c0_5 = arith.constant 0 : index
    %c0_6 = arith.constant 0 : index
    %26 = vector.load %arg2[%c0_5, %c0_6] : memref<1x128xf32, #tpu.memory_space<vmem>>, vector<1x128xf32>
    tpu.vector_store %arg2[%c0_5, %c0_6], %25 {strides = array<i32>} : memref<1x128xf32, #tpu.memory_space<vmem>>, vector<1x128xf32>,
    return
  }
  func.func @transform_0(%arg0: i32) -> (i32, i32) {
    %c0_i32 = arith.constant 0 : i32
    %c0_i32_0 = arith.constant 0 : i32
    return %arg0, %c0_i32 : i32, i32
  }
  func.func @transform_1(%arg0: i32) -> (i32, i32) {
    %c0_i32 = arith.constant 0 : i32
    %c0_i32_0 = arith.constant 0 : i32
    return %c0_i32, %arg0 : i32, i32
  }
}

</mosaic_0001>

<bundles_post_ra>
// kernel: my_criterion_em.1
= control target key start
LH: loop header
LB: loop body
LE: loop exit
PB: predicated region body
PF: predicated region fallthrough
CT: control target
= control target key end

     0   :  { %s193_s0 = inlined_call_operand.vmem [shape: f32[128,32], index: 0, kind: input, shape index: {}]   ;;  %s194_s1 = inlined_call_operand.vmem [shape: f32[1,128], index: 1, kind: output, shape index: {}]  }
   0x1   :  { %v8_v0 = vld [vmem:[%s193_s0] sm:$0xff]  ;;  %v9_v1 = vld [vmem:[%s193_s0 + $0x8] sm:$0xff]  ;;  %v10_v2 = vld [vmem:[%s193_s0 + $0x10] sm:$0xff] }
   0x2   :  { %24 = vxpose.xlu0.b32.start [1/16] (narrow) %v8_v0, 32  ;;  %v11_v3 = vld [vmem:[%s193_s0 + $0x18] sm:$0xff]  ;;  %v12_v4 = vld [vmem:[%s193_s0 + $0x20] sm:$0xff]  ;;  %v13_v5 = vld [vmem:[%s193_s0 + $0x28] sm:$0xff] }
   0x3   :  { %v14_v6 = vld [vmem:[%s193_s0 + $0x30] sm:$0xff]  ;;  %v15_v7 = vld [vmem:[%s193_s0 + $0x38] sm:$0xff]  ;;  %v16_v8 = vld [vmem:[%s193_s0 + $0x40] sm:$0xff] }
   0x4   :  { %v17_v9 = vld [vmem:[%s193_s0 + $0x48] sm:$0xff]  ;;  %v18_v10 = vld [vmem:[%s193_s0 + $0x50] sm:$0xff]  ;;  %v19_v11 = vld [vmem:[%s193_s0 + $0x58] sm:$0xff] }
   0x5   :  { %v20_v12 = vld [vmem:[%s193_s0 + $0x60] sm:$0xff]  ;;  %v21_v13 = vld [vmem:[%s193_s0 + $0x68] sm:$0xff]  ;;  %v22_v14 = vld [vmem:[%s193_s0 + $0x70] sm:$0xff] }
   0x6   :  { %25 = vxpose.xlu0.b32.cont [2/16] (narrow) %v9_v1, 32  ;;  %v23_v15 = vld [vmem:[%s193_s0 + $0x78] sm:$0xff] }
   0xa   :  { %26 = vxpose.xlu0.b32.cont [3/16] (narrow) %v10_v2, 32 }
   0xe   :  { %27 = vxpose.xlu0.b32.cont [4/16] (narrow) %v11_v3, 32 }
  0x12   :  { %28 = vxpose.xlu0.b32.cont [5/16] (narrow) %v12_v4, 32 }
  0x16   :  { %29 = vxpose.xlu0.b32.cont [6/16] (narrow) %v13_v5, 32 }
  0x1a   :  { %30 = vxpose.xlu0.b32.cont [7/16] (narrow) %v14_v6, 32 }
  0x1e   :  { %31 = vxpose.xlu0.b32.cont [8/16] (narrow) %v15_v7, 32 }
  0x22   :  { %32 = vxpose.xlu0.b32.cont [9/16] (narrow) %v16_v8, 32 }
  0x26   :  { %33 = vxpose.xlu0.b32.cont [10/16] (narrow) %v17_v9, 32 }
  0x2a   :  { %34 = vxpose.xlu0.b32.cont [11/16] (narrow) %v18_v10, 32 }
  0x2e   :  { %35 = vxpose.xlu0.b32.cont [12/16] (narrow) %v19_v11, 32 }
  0x32   :  { %36 = vxpose.xlu0.b32.cont [13/16] (narrow) %v20_v12, 32 }
  0x36   :  { %37 = vxpose.xlu0.b32.cont [14/16] (narrow) %v21_v13, 32 }
  0x3a   :  { %38 = vxpose.xlu0.b32.cont [15/16] (narrow) %v22_v14, 32 }
  0x3e   :  { %39 = vxpose.xlu0.b32.end [16/16] (narrow) %v23_v15, 32 }
  0x82   :  { %v40_v16 = vpop.trf.xlu0 }
  0x86   :  { %v41_v17 = vpop.trf.xlu0 }
  0x87   :  { %v56_v20 = vmax.f32 %v40_v16, %v41_v17 }
  0x8a   :  { %v42_v18 = vpop.trf.xlu0 }
  0x8e   :  { %v43_v19 = vpop.trf.xlu0 }
  0x8f   :  { %v57_v21 = vmax.f32 %v42_v18, %v43_v19 }
  0x91   :  { %v58_v22 = vmax.f32 %v56_v20, %v57_v21 }
  0x93   :  { %v59_v23 = vrot.slane %v58_v22, 4 }
  0x95   :  { %v60_v24 = vmax.f32 %v58_v22, %v59_v23 }
  0x97   :  { %v61_v25 = vrot.slane %v60_v24, 2 }
  0x99   :  { %v62_v26 = vmax.f32 %v60_v24, %v61_v25 }
  0x9b   :  { %v63_v27 = vrot.slane %v62_v26, 1 }
  0x9d   :  { %v64_v28 = vmax.f32 %v62_v26, %v63_v27 }
  0x9f   :  { %v65_v29 = vsub.f32 %v40_v16, %v64_v28  ;;  %v66_v30 = vsub.f32 %v41_v17, %v64_v28  ;;  %v67_v31 = vsub.f32 %v42_v18, %v64_v28  ;;  %v68_v32 = vsub.f32 %v43_v19, %v64_v28 }
  0xa1   :  { %v69_v33 = vmul.f32 1.442695, %v65_v29  ;;  %v71_v34 = vmul.f32 1.442695, %v66_v30  ;;  %v73_v35 = vmul.f32 1.442695, %v67_v31 }
  0xa2   :  { %v75_v36 = vmul.f32 1.442695, %v68_v32 }
  0xa3   :  { %116 = vpow2.f32 %v69_v33 }
  0xa4   :  { %118 = vpow2.f32 %v71_v34 }
  0xa5   :  { %120 = vpow2.f32 %v73_v35 }
  0xa6   :  { %122 = vpow2.f32 %v75_v36 }
  0xad   :  { %v117_v37 = vpop.eup %116 }
  0xae   :  { %v119_v38 = vpop.eup %118 }
  0xaf   :  { %v121_v39 = vpop.eup %120  ;;  %v77_v40 = vadd.f32 %v119_v38, %v117_v37 }
  0xb0   :  { %v123_v41 = vpop.eup %122  ;;  %v86_v42 = vadd.f32 %v121_v39, %v117_v37 }
  0xb1   :  { %v78_v43 = vadd.f32 %v121_v39, %v77_v40  ;;  %v87_v44 = vadd.f32 %v123_v41, %v119_v38 }
  0xb2   :  { %v88_v45 = vmax.f32 %v86_v42, 1.1754944e-38 }
  0xb3   :  { %v79_v46 = vadd.f32 %v123_v41, %v78_v43  ;;  %v89_v47 = vmax.f32 %v87_v44, 1.1754944e-38 }
  0xb4   :  { %124 = vlog2.f32 %v88_v45 }
  0xb5   :  { %v80_v48 = vrot.slane %v79_v46, 4  ;;  %126 = vlog2.f32 %v89_v47 }
  0xb7   :  { %v81_v49 = vadd.f32 %v80_v48, %v79_v46 }
  0xb9   :  { %v82_v50 = vrot.slane %v81_v49, 2 }
  0xbb   :  { %v83_v51 = vadd.f32 %v82_v50, %v81_v49 }
  0xbd   :  { %v84_v52 = vrot.slane %v83_v51, 1 }
  0xbe   :  { %v125_v53 = vpop.eup %124 }
  0xbf   :  { %v127_v54 = vpop.eup %126  ;;  %v85_v55 = vadd.f32 %v84_v52, %v83_v51  ;;  %v91_v56 = vmul.f32 0.6931472, %v125_v53 }
  0xc0   :  { %v93_v57 = vmul.f32 0.6931472, %v127_v54 }
  0xc1   :  { %v94_v58 = vmul.f32 %v91_v56, %v86_v42  ;;  %128 = vrcp.f32 %v85_v55 }
  0xc2   :  { %v95_v59 = vmul.f32 %v93_v57, %v87_v44  ;;  %130 = vlog2.f32 %v85_v55 }
  0xc4   :  { %v96_v60 = vadd.f32 %v95_v59, %v94_v58 }
  0xc6   :  { %v97_v61 = vrot.slane %v96_v60, 4 }
  0xc8   :  { %v98_v62 = vadd.f32 %v97_v61, %v96_v60 }
  0xca   :  { %v99_v63 = vrot.slane %v98_v62, 2 }
  0xcb   :  { %v129_v0 = vpop.eup %128 }
  0xcc   :  { %v100_v1 = vadd.f32 %v99_v63, %v98_v62  ;;  %v104_v2 = vmul.f32 %v129_v0, %v85_v55  ;;  %v131_v5 = vpop.eup %130 }
  0xcd   :  { %v108_v8 = vmul.f32 0.6931472, %v131_v5 }
  0xce   :  { %v101_v3 = vrot.slane %v100_v1, 1  ;;  %v105_v4 = vsub.f32 2.0, %v104_v2 }
  0xd0   :  { %v102_v6 = vadd.f32 %v101_v3, %v100_v1  ;;  %v106_v7 = vmul.f32 %v129_v0, %v105_v4 }
  0xd2   :  { %v109_v9 = vmul.f32 %v106_v7, %v102_v6 }
  0xd4   :  { %v110_v10 = vsub.f32 %v108_v8, %v109_v9 }
  0xd6   :  { %111 = vst [vmem:[%s194_s1] sm:$0x1] %v110_v10 }

</bundles_post_ra>
